<compile_context>
chip_gen: v6e
topology: v6e:2x2x1
jax: 0.10.0
libtpu: 0.0.40
codegen_flags: <defaults>
</compile_context>

<pallas_src>
import numpy as np
import jax
import jax.numpy as jnp
from jax.experimental import pallas as pl
from jax.experimental.pallas import tpu as pltpu


# ----------------------------------------------------------------------------
# helpers
# ----------------------------------------------------------------------------
def _round_up(x, m):
    return ((x + m - 1) // m) * m


def _pick_tile(total, prefer=(512, 256, 128)):
    for c in prefer:
        if total % c == 0:
            return c
    return 128  # total is always a multiple of 128 after padding


# ----------------------------------------------------------------------------
# Pallas kernel: standard tiled matmul  O = X @ B  with fp32 accumulator.
#   X: (TM, TK) block, B: (TK, TN) block, O: (TM, TN) block.
#   1/env is already folded into B, so no epilogue math is needed.
# ----------------------------------------------------------------------------
def _istft_matmul_kernel(x_ref, b_ref, o_ref, acc_ref):
    @pl.when(pl.program_id(2) == 0)
    def _():
        acc_ref[...] = jnp.zeros_like(acc_ref)

    acc_ref[...] += jnp.dot(x_ref[...], b_ref[...],
                            preferred_element_type=jnp.float32)

    @pl.when(pl.program_id(2) == pl.num_programs(2) - 1)
    def _():
        o_ref[...] = acc_ref[...].astype(o_ref.dtype)


# ----------------------------------------------------------------------------
# Constant synthesis matrix (analytic, no learned params).
# Folds: onesided irFFT basis * window -> overlap-add -> center trim -> 1/env.
# Row layout: rows [0, K)      = real coeffs, ordered (frame t, freq f)
#             rows [K, 2K)     = imag coeffs, ordered (frame t, freq f)
# Zero-padded to (k_pad, ns_pad) for lane/contraction alignment.
# ----------------------------------------------------------------------------
def _build_synthesis(win_len, win_shift_ratio, nfft, nt, k_pad, ns_pad):
    N = nfft
    nf = N // 2 + 1
    hop = int(win_len * win_shift_ratio)
    nsample = (nt - 1) * hop
    n0 = N // 2                                   # center-trim offset
    K = nt * nf

    # default torch.istft window: ones(win_len), centered-padded to n_fft
    win = np.zeros(N, dtype=np.float64)
    left = (N - win_len) // 2
    win[left:left + win_len] = 1.0

    # onesided irFFT basis (backward norm; imag of DC / Nyquist ignored)
    kk = np.arange(nf)[:, None]
    nn = np.arange(N)[None, :]
    ck = np.full(nf, 2.0)
    ck[0] = 1.0
    if N % 2 == 0:
        ck[-1] = 1.0
    ang = 2.0 * np.pi * kk * nn / N
    Cr = (ck[:, None] / N) * np.cos(ang) * win[None, :]    # (nf, N)
    Ci = -(ck[:, None] / N) * np.sin(ang) * win[None, :]   # (nf, N)

    B = np.zeros((k_pad, ns_pad), dtype=np.float64)
    env = np.zeros(nsample, dtype=np.float64)
    for t in range(nt):
        s = np.arange(N) + t * hop - n0            # output positions of frame t
        valid = (s >= 0) & (s < nsample)
        nv = np.arange(N)[valid]
        sv = s[valid]
        B[t * nf:(t + 1) * nf, sv] = Cr[:, nv]
        B[K + t * nf:K + (t + 1) * nf, sv] = Ci[:, nv]
        env[sv] += win[nv] ** 2

    if not np.all(env > 0):
        raise ValueError("window/hop combination produces zero OLA envelope")
    # fold 1/env into the valid columns (padding columns stay exactly zero)
    B[:, :nsample] /= env[None, :]
    return B.astype(np.float32), hop, nsample


# ----------------------------------------------------------------------------
# Wrapper: layout plumbing + pallas_call
# ----------------------------------------------------------------------------
def istft_pallas(stft, win_len, win_shift_ratio, nfft):
    """stft: complex64 (nb, nf, nt, nch) -> float32 (nb, nsample, nch)."""
    nb, nf, nt, nch = stft.shape
    assert nf == nfft // 2 + 1, "stft freq dim must be nfft//2 + 1"

    K = nt * nf
    K2 = 2 * K
    BC = nb * nch

    # --- tile sizes (lane-dense, (8,128)-aligned) ---
    TM = 128 if BC >= 128 else _round_up(BC, 8)
    BC_pad = _round_up(BC, TM)
    hop = int(win_len * win_shift_ratio)
    nsample = (nt - 1) * hop
    NS_pad = _round_up(nsample, 128)
    TN = _pick_tile(NS_pad)
    K_pad = _round_up(K2, 128)
    TK = _pick_tile(K_pad)

    B_np, hop_chk, nsample_chk = _build_synthesis(
        win_len, win_shift_ratio, nfft, nt, K_pad, NS_pad)
    assert (hop_chk, nsample_chk) == (hop, nsample)
    B = jnp.asarray(B_np)                                   # (K_pad, NS_pad)

    # (nb, nf, nt, nch) -> (nb, nch, nt, nf) -> (BC, K); concat re/im -> (BC, 2K)
    xc = jnp.transpose(stft, (0, 3, 2, 1)).reshape(BC, K)
    x = jnp.concatenate([jnp.real(xc), jnp.imag(xc)], axis=-1)
    x = x.astype(jnp.float32)
    x = jnp.pad(x, ((0, BC_pad - BC), (0, K_pad - K2)))     # (BC_pad, K_pad)

    grid = (BC_pad // TM, NS_pad // TN, K_pad // TK)

    out = pl.pallas_call(
        _istft_matmul_kernel,
        out_shape=jax.ShapeDtypeStruct((BC_pad, NS_pad), jnp.float32),
        grid_spec=pltpu.PrefetchScalarGridSpec(
            num_scalar_prefetch=0,
            grid=grid,
            in_specs=[
                pl.BlockSpec((TM, TK), lambda i, j, k: (i, k)),   # X block
                pl.BlockSpec((TK, TN), lambda i, j, k: (k, j)),   # B block
            ],
            out_specs=pl.BlockSpec((TM, TN), lambda i, j, k: (i, j)),
            scratch_shapes=[pltpu.VMEM((TM, TN), jnp.float32)],
        ),
        compiler_params=pltpu.CompilerParams(
            dimension_semantics=("parallel", "parallel", "arbitrary")),
    )(x, B)

    # strip padding, (BC, nsample) -> (nb, nch, nsample) -> (nb, nsample, nch)
    y = out[:BC, :nsample].reshape(nb, nch, nsample).transpose(0, 2, 1)
    return y


# ----------------------------------------------------------------------------
# Pure-numpy reference (mirrors torch.istft: center=True, ones window)
# ----------------------------------------------------------------------------
def _ref_istft_np(stft_c, win_len, win_shift_ratio, nfft):
    nb, nf, nt, nch = stft_c.shape
    hop = int(win_len * win_shift_ratio)
    nsample = (nt - 1) * hop
    N = nfft
    n0 = N // 2
    win = np.zeros(N)
    left = (N - win_len) // 2
    win[left:left + win_len] = 1.0
    out = np.zeros((nb, nsample, nch), dtype=np.float32)
    for b in range(nb):
        for c in range(nch):
            frames = np.fft.irfft(stft_c[b, :, :, c].T, n=N, axis=-1)  # (nt, N)
            frames = frames * win[None, :]
            L = N + hop * (nt - 1)
            y = np.zeros(L)
            env = np.zeros(L)
            for t in range(nt):
                y[t * hop:t * hop + N] += frames[t]
                env[t * hop:t * hop + N] += win ** 2
            out[b, :, c] = (y[n0:n0 + nsample] /
                            env[n0:n0 + nsample]).astype(np.float32)
    return out


if __name__ == "__main__":
    # module config (small): win_len=16, hop ratio 0.5, nfft=16
    win_len, win_shift_ratio, nfft = 16, 0.5, 16
    nb, nch, nt = 2, 4, 8
    nf = nfft // 2 + 1                      # 9

    key = jax.random.PRNGKey(0)
    kr, ki = jax.random.split(key)
    real = jax.random.normal(kr, (nb, nf, nt, nch), dtype=jnp.float32)
    imag = jax.random.normal(ki, (nb, nf, nt, nch), dtype=jnp.float32)
    stft = (real + 1j * imag).astype(jnp.complex64)

    sig = istft_pallas(stft, win_len, win_shift_ratio, nfft)
    sig = jax.block_until_ready(sig)

    ref = _ref_istft_np(np.asarray(stft), win_len, win_shift_ratio, nfft)
    assert sig.shape == ref.shape, (sig.shape, ref.shape)
    np.testing.assert_allclose(np.asarray(sig), ref, rtol=1e-4, atol=1e-4)

    print("KERNEL_OK")
</pallas_src>

<mosaic_0001>
module attributes {stable_mosaic.version = 11 : i64} {
  func.func @_istft_matmul_kernel(%arg0: i32, %arg1: i32, %arg2: i32, %arg3: memref<8x256xf32, #tpu.memory_space<vmem>>, %arg4: memref<256x128xf32, #tpu.memory_space<vmem>>, %arg5: memref<8x128xf32, #tpu.memory_space<vmem>>, %arg6: memref<8x128xf32, #tpu.memory_space<vmem>>) attributes {dimension_semantics = [#tpu.dimension_semantics<parallel>, #tpu.dimension_semantics<parallel>, #tpu.dimension_semantics<arbitrary>], iteration_bounds = array<i64: 1, 1, 1>, scalar_prefetch = 0 : i64, scratch_operands = 1 : i64, tpu.core_type = #tpu.core_type<tc>, window_params = [{transform_indices = @transform_0, window_bounds = array<i64: 8, 256>}, {transform_indices = @transform_1, window_bounds = array<i64: 256, 128>}, {transform_indices = @transform_2, window_bounds = array<i64: 8, 128>}]} {
    %c0_i32 = arith.constant 0 : i32
    %0 = arith.cmpi eq, %arg2, %c0_i32 : i32
    %1 = arith.extui %0 : i1 to i32
    %c0_i32_0 = arith.constant 0 : i32
    %2 = arith.cmpi ne, %1, %c0_i32_0 : i32
    scf.if %2 {
      %cst_10 = arith.constant 0.000000e+00 : f32
      %12 = vector.broadcast %cst_10 : f32 to vector<8x128xf32>
      %c0_11 = arith.constant 0 : index
      %c0_12 = arith.constant 0 : index
      %13 = vector.load %arg6[%c0_11, %c0_12] : memref<8x128xf32, #tpu.memory_space<vmem>>, vector<8x128xf32>
      tpu.vector_store %arg6[%c0_11, %c0_12], %12 {strides = array<i32>} : memref<8x128xf32, #tpu.memory_space<vmem>>, vector<8x128xf32>,
    } else {
    }
    %c0 = arith.constant 0 : index
    %c0_1 = arith.constant 0 : index
    %3 = vector.load %arg6[%c0, %c0_1] : memref<8x128xf32, #tpu.memory_space<vmem>>, vector<8x128xf32>
    %c0_2 = arith.constant 0 : index
    %c0_3 = arith.constant 0 : index
    %4 = vector.load %arg3[%c0_2, %c0_3] : memref<8x256xf32, #tpu.memory_space<vmem>>, vector<8x256xf32>
    %c0_4 = arith.constant 0 : index
    %c0_5 = arith.constant 0 : index
    %5 = vector.load %arg4[%c0_4, %c0_5] : memref<256x128xf32, #tpu.memory_space<vmem>>, vector<256x128xf32>
    %cst = arith.constant dense<0.000000e+00> : vector<8x128xf32>
    %6 = tpu.matmul %4, %5, %cst {dimension_numbers = #tpu.dot_dimension_numbers<[1], [0], [0], [1], [0, 0, 1, 1], [], []>} : vector<8x256xf32>, vector<256x128xf32>, vector<8x128xf32> -> vector<8x128xf32>
    %7 = arith.addf %3, %6 : vector<8x128xf32>
    %c0_6 = arith.constant 0 : index
    %c0_7 = arith.constant 0 : index
    %8 = vector.load %arg6[%c0_6, %c0_7] : memref<8x128xf32, #tpu.memory_space<vmem>>, vector<8x128xf32>
    tpu.vector_store %arg6[%c0_6, %c0_7], %7 {strides = array<i32>} : memref<8x128xf32, #tpu.memory_space<vmem>>, vector<8x128xf32>,
    %c0_i32_8 = arith.constant 0 : i32
    %9 = arith.cmpi eq, %arg2, %c0_i32_8 : i32
    %10 = arith.extui %9 : i1 to i32
    %c0_i32_9 = arith.constant 0 : i32
    %11 = arith.cmpi ne, %10, %c0_i32_9 : i32
    scf.if %11 {
      %c0_10 = arith.constant 0 : index
      %c0_11 = arith.constant 0 : index
      %12 = vector.load %arg6[%c0_10, %c0_11] : memref<8x128xf32, #tpu.memory_space<vmem>>, vector<8x128xf32>
      %c0_12 = arith.constant 0 : index
      %c0_13 = arith.constant 0 : index
      %13 = vector.load %arg5[%c0_12, %c0_13] : memref<8x128xf32, #tpu.memory_space<vmem>>, vector<8x128xf32>
      tpu.vector_store %arg5[%c0_12, %c0_13], %12 {strides = array<i32>} : memref<8x128xf32, #tpu.memory_space<vmem>>, vector<8x128xf32>,
    } else {
    }
    return
  }
  func.func @transform_0(%arg0: i32, %arg1: i32, %arg2: i32) -> (i32, i32) {
    %c0_i32 = arith.constant 0 : i32
    return %arg0, %arg2 : i32, i32
  }
  func.func @transform_1(%arg0: i32, %arg1: i32, %arg2: i32) -> (i32, i32) {
    %c0_i32 = arith.constant 0 : i32
    return %arg2, %arg1 : i32, i32
  }
  func.func @transform_2(%arg0: i32, %arg1: i32, %arg2: i32) -> (i32, i32) {
    %c0_i32 = arith.constant 0 : i32
    return %arg0, %arg1 : i32, i32
  }
}

</mosaic_0001>

<bundles_post_ra>
// kernel: tpu_custom_call.1
= control target key start
LH: loop header
LB: loop body
LE: loop exit
PB: predicated region body
PF: predicated region fallthrough
CT: control target
= control target key end

     0   :  { %7 = vsyncpa [#allocation4], 0  ;;  %s306_s0 = inlined_call_operand.hbm [shape: f32[8,256], index: 0, kind: input, shape index: {}]   ;;  %s307_s1 = inlined_call_operand.hbm [shape: f32[256,128], index: 1, kind: input, shape index: {}]   ;;  %s308_s2 = inlined_call_operand.hbm [shape: f32[8,128], index: 2, kind: output, shape index: {}]  }
   0x1   :  { %8 = vsyncpa [#allocation7], 0 }
   0x2   :  { %9 = vsyncpa [#allocation5], 0  ;;  %s277_s9 = smov [#allocation3]   ;;  %s278_s11 = smov [#allocation6]  }
   0x3   :  { %s16_s10 = sshll.u32 %s277_s9, 4  ;;  %s25_s12 = sshll.u32 %s278_s11, 4  ;;  %s17_s10 = int_to_ptr.vmem [resolvable:$true] %s16_s10  ;;  %s26_s12 = int_to_ptr.vmem [resolvable:$true] %s25_s12 }
   0x4   :  { %s219_s13 = scalar_lea.vmem %s17_s10, 256  ;;  %p224_p1 = scmp.lt.s32.totalorder %s17_s10, %s17_s10 }
   0x5   :  { %p220_p0 = scmp.ne.s32.totalorder %s17_s10, %s219_s13  ;;  %p225_p2 = scmp.lt.s32.totalorder %s219_s13, %s219_s13 }
   0x7   :  { %p226_p3 = por %p225_p2, %p224_p1 }
   0x9   :  { %p227_p4 = pnand %p226_p3, %p220_p0 }
   0xb   :  { %230 = shalt.err (!%p227_p4)
}
   0xc   :  { %19 = dma.hbm_to_vmem [thread:$0]  %s306_s0, 256, %s17_s10, [#allocation4]  }
   0xd   :  { %s239_s16 = scalar_lea.vmem %s26_s12, 4096  ;;  %p244_p6 = scmp.lt.s32.totalorder %s26_s12, %s26_s12 }
   0xe   :  { %p240_p5 = scmp.ne.s32.totalorder %s26_s12, %s239_s16  ;;  %p245_p7 = scmp.lt.s32.totalorder %s239_s16, %s239_s16 }
  0x10   :  { %p246_p8 = por %p245_p7, %p244_p6 }
  0x12   :  { %p247_p9 = pnand %p246_p8, %p240_p5 }
  0x14   :  { %250 = shalt.err (!%p247_p9)
}
  0x15   :  { %s279_s17 = smov 128   ;;  %s280_s18 = smov 8  }
  0x16   :  { %31 = dma.hbm_to_vmem [thread:$0]  %s307_s1, 4096, %s26_s12, [#allocation7], %s279_s17, %s279_s17, %s280_s18  }
  0x17   :  { %271 = dma.done.wait [#allocation4], 256  }
  0x18   :  { %272 = vsyncadd [#allocation4], 4294967040 }
  0x19   :  { %273 = dma.done.wait [#allocation7], 4096  }
  0x1a   :  { %274 = vsyncadd [#allocation7], 4294963200  ;;  %v77_v0 = vld [vmem:[#allocation6 + $0xf8] sm:$0xff]  ;;  %v76_v2 = vld [vmem:[#allocation6 + $0xf0] sm:$0xff]  ;;  %s281_s0 = smov [#allocation8]  }
  0x1b   :  { %v61_v1 = vld [vmem:[#allocation6 + $0x78] sm:$0xff]  ;;  %171 = vmatprep.subr.mxu0 %v77_v0  ;;  %v60_v3 = vld [vmem:[#allocation6 + $0x70] sm:$0xff]  ;;  %v75_v4 = vld [vmem:[#allocation6 + $0xe8] sm:$0xff]  ;;  %s161_s1 = sshll.u32 %s281_s0, 4  ;;  %s162_s1 = int_to_ptr.vmem [resolvable:$true] %s161_s1 }
  0x1c   :  { %172 = vmatpush3.msra.mxu0 %v61_v1  ;;  %v59_v5 = vld [vmem:[#allocation6 + $0x68] sm:$0xff]  ;;  %v74_v6 = vld [vmem:[#allocation6 + $0xe0] sm:$0xff]  ;;  %v73_v8 = vld [vmem:[#allocation6 + $0xd8] sm:$0xff]  ;;  %s251_s21 = scalar_lea.vmem %s162_s1, 128  ;;  %p256_p11 = scmp.lt.s32.totalorder %s162_s1, %s162_s1 }
  0x1d   :  { %173 = vmatprep.subr.mxu0 %v76_v2  ;;  %v58_v7 = vld [vmem:[#allocation6 + $0x60] sm:$0xff]  ;;  %v57_v9 = vld [vmem:[#allocation6 + $0x58] sm:$0xff]  ;;  %v72_v10 = vld [vmem:[#allocation6 + $0xd0] sm:$0xff]  ;;  %p252_p10 = scmp.ne.s32.totalorder %s162_s1, %s251_s21  ;;  %p257_p12 = scmp.lt.s32.totalorder %s251_s21, %s251_s21 }
  0x1e   :  { %174 = vmatpush3.msra.mxu0 %v60_v3  ;;  %v56_v11 = vld [vmem:[#allocation6 + $0x50] sm:$0xff]  ;;  %v71_v12 = vld [vmem:[#allocation6 + $0xc8] sm:$0xff]  ;;  %v45_v13 = vld [vmem:[#allocation3 + $0x8] sm:$0xff] }
  0x1f   :  { %175 = vmatprep.subr.mxu0 %v75_v4  ;;  %v55_v14 = vld [vmem:[#allocation6 + $0x48] sm:$0xff]  ;;  %142 = vmatprep.mubr.f32.mxu0 %v45_v13  ;;  %v70_v15 = vld [vmem:[#allocation6 + $0xc0] sm:$0xff]  ;;  %v69_v17 = vld [vmem:[#allocation6 + $0xb8] sm:$0xff]  ;;  %p258_p13 = por %p257_p12, %p256_p11 }
  0x20   :  { %176 = vmatpush3.msra.mxu0 %v59_v5  ;;  %v54_v16 = vld [vmem:[#allocation6 + $0x40] sm:$0xff]  ;;  %v53_v18 = vld [vmem:[#allocation6 + $0x38] sm:$0xff]  ;;  %v68_v19 = vld [vmem:[#allocation6 + $0xb0] sm:$0xff] }
  0x21   :  { %177 = vmatprep.subr.mxu0 %v74_v6  ;;  %v52_v20 = vld [vmem:[#allocation6 + $0x30] sm:$0xff]  ;;  %v67_v21 = vld [vmem:[#allocation6 + $0xa8] sm:$0xff]  ;;  %v66_v23 = vld [vmem:[#allocation6 + $0xa0] sm:$0xff]  ;;  %p259_p0 = pnand %p258_p13, %p252_p10 }
  0x22   :  { %178 = vmatpush3.msra.mxu0 %v58_v7  ;;  %v51_v22 = vld [vmem:[#allocation6 + $0x28] sm:$0xff]  ;;  %v50_v24 = vld [vmem:[#allocation6 + $0x20] sm:$0xff]  ;;  %v65_v25 = vld [vmem:[#allocation6 + $0x98] sm:$0xff] }
  0x23   :  { %179 = vmatprep.subr.mxu0 %v73_v8  ;;  %v49_v26 = vld [vmem:[#allocation6 + $0x18] sm:$0xff]  ;;  %v64_v27 = vld [vmem:[#allocation6 + $0x90] sm:$0xff]  ;;  %v63_v29 = vld [vmem:[#allocation6 + $0x88] sm:$0xff] }
  0x24   :  { %180 = vmatpush3.msra.mxu0 %v57_v9  ;;  %v48_v28 = vld [vmem:[#allocation6 + $0x10] sm:$0xff]  ;;  %v47_v30 = vld [vmem:[#allocation6 + $0x8] sm:$0xff]  ;;  %v62_v31 = vld [vmem:[#allocation6 + $0x80] sm:$0xff] }
  0x25   :  { %181 = vmatprep.subr.mxu0 %v72_v10  ;;  %v46_v32 = vld [vmem:[#allocation6] sm:$0xff]  ;;  %v44_v33 = vld [vmem:[#allocation3] sm:$0xff] }
  0x26   :  { %182 = vmatpush3.msra.mxu0 %v56_v11 }
  0x27   :  { %183 = vmatprep.subr.mxu0 %v71_v12 }
  0x28   :  { %184 = vmatpush3.msra.mxu0 %v55_v14 }
  0x29   :  { %185 = vmatprep.subr.mxu0 %v70_v15 }
  0x2a   :  { %186 = vmatpush3.msra.mxu0 %v54_v16 }
  0x2b   :  { %187 = vmatprep.subr.mxu0 %v69_v17 }
  0x2c   :  { %188 = vmatpush3.msra.mxu0 %v53_v18 }
  0x2d   :  { %189 = vmatprep.subr.mxu0 %v68_v19 }
  0x2e   :  { %190 = vmatpush3.msra.mxu0 %v52_v20 }
  0x2f   :  { %191 = vmatprep.subr.mxu0 %v67_v21 }
  0x30   :  { %192 = vmatpush3.msra.mxu0 %v51_v22 }
  0x31   :  { %193 = vmatprep.subr.mxu0 %v66_v23 }
  0x32   :  { %194 = vmatpush3.msra.mxu0 %v50_v24 }
  0x33   :  { %195 = vmatprep.subr.mxu0 %v65_v25 }
  0x34   :  { %196 = vmatpush3.msra.mxu0 %v49_v26 }
  0x35   :  { %197 = vmatprep.subr.mxu0 %v64_v27 }
  0x36   :  { %198 = vmatpush3.msra.mxu0 %v48_v28 }
  0x37   :  { %199 = vmatprep.subr.mxu0 %v63_v29 }
  0x38   :  { %200 = vmatpush3.msra.mxu0 %v47_v30 }
  0x39   :  { %201 = vmatprep.subr.mxu0 %v62_v31 }
  0x3a   :  { %202 = vmatpush3.msra.mxu0 %v46_v32 }
  0x3b   :  { %143 = vmatmul.mubr.f32.vlgmr.msra.gmra.mxu0 %v44_v33 }
  0xfb   :  { %v203_v34 = vpop.f32.mrf.mxu0 }
  0xfd   :  { %v204_v35 = vpop.f32.mrf.mxu0 }
  0xfe   :  { %v205_v36 = vadd.f32 %v204_v35, %v203_v34 }
 0x100   :  { %154 = vst [vmem:[#allocation8] sm:$0xff] %v205_v36 }
 0x101   :  { %262 = shalt.err (!%p259_p0)
}
 0x102   :  { %164 = dma.vmem_to_hbm [thread:$0]  %s162_s1, 128, %s308_s2, [#allocation5]  }
 0x103   :  { %275 = dma.done.wait [#allocation5], 128  }
 0x104   :  { %276 = vsyncadd [#allocation5], 4294967168 }
 0x105   :  { %168 = vsyncpa [#allocation4], 1 }
 0x106   :  { %169 = vsyncpa [#allocation7], 1 }
 0x107   :  { %170 = vsyncpa [#allocation5], 1 }

</bundles_post_ra>
